<compile_context>
chip_gen: v5e
topology: v5e:2x2
jax: 0.10.0
libtpu: 0.0.40
codegen_flags: <defaults>
</compile_context>

<pallas_src>
import math

import jax
import jax.numpy as jnp
from jax.experimental import pallas as pl
from jax.experimental.pallas import tpu as pltpu


# ----------------------------------------------------------------------------
# Glue: fold channel_shuffle into weights, build banded per-row matmul weights
# ----------------------------------------------------------------------------
def _shuffle_src(C, group):
    # channel_shuffle: out[o] = in[src[o]]  (matches torch reshape/permute/reshape)
    gc = C // group
    return jnp.arange(C).reshape(gc, group).T.reshape(-1)


def _fold_shuffle_into_weight(w_hwio, group):
    # conv(shuffle(f), w) == conv(f, w[:, :, argsort(src), :])
    src = _shuffle_src(w_hwio.shape[2], group)
    inv = jnp.argsort(src)
    return w_hwio[:, :, inv, :]


def _band_weight(w_hwio, W):
    """HWIO (3,3,Cin,Cout) -> (3, W*Cin, W*Cout) banded matrices (one per dy).

    dx zero-padding is folded into the band: out-of-range taps are omitted, so the
    activation rows need no side columns and K = W*Cin exactly.
      Row index  u*Cin + c  : input pixel column u, input channel c.
      Col index  j*Cout + d : output pixel column j, output channel d.
      Entry = w[dy, u - j + 1, c, d] if 0 <= u - j + 1 <= 2 else 0.
    conv(x)[i, j, d] = sum_dy (x_rows[i - 1 + dy] @ M[dy])[j*Cout + d]
    (rows are padded vertically only, with zero rows above/below each image).
    """
    kh, kw, cin, cout = w_hwio.shape
    u = jnp.arange(W)[:, None]
    j = jnp.arange(W)[None, :]
    S = jnp.stack([(u == (j + dx - 1)).astype(w_hwio.dtype) for dx in range(kw)], axis=0)
    M = jnp.einsum("xuj,yxcd->yucjd", S, w_hwio)          # (kh, W, Cin, W, Cout)
    return M.reshape(kh, W * cin, W * cout)


# ----------------------------------------------------------------------------
# Fused Pallas kernel: Bt images per grid step, stacked along M of the matmuls
# ----------------------------------------------------------------------------
def _make_efr_kernel(H, W, cin, c1, cout, bt):
    HP = H + 2                      # per-image rows incl. top/bottom zero pad
    m_out = bt * HP - 2             # matmul M (2 unused rows per inner image boundary)
    xw = W * cin                    # x lane-block width
    aw = W * c1                     # x1 / x2 lane-block widths
    lw = xw + 2 * aw                # combined scratch lane width (= 128 here)

    def kernel(x_ref, w1_ref, w2_ref, w3_ref, o_ref, comb):
        zrow = jnp.zeros((1, lw), jnp.float32)

        def zero_pad_rows():
            # Only the 2 pad rows per image; interiors are fully rewritten each step.
            # Per-step on purpose (gating on program_id==0 breaks under megacore).
            for b in range(bt):
                comb[b * HP:b * HP + 1, :] = zrow
                comb[b * HP + H + 1:b * HP + H + 2, :] = zrow

        def conv_relu(w_ref, kcols):
            # One matmul per kernel row dy: the dx taps, the channel contraction and
            # the source concat (x / x1 / x2) are all packed into K.
            acc = None
            for dy in range(3):                              # static unrolled tap-row loop
                part = jnp.dot(comb[dy:dy + m_out, 0:kcols], w_ref[dy],
                               preferred_element_type=jnp.float32)
                acc = part if acc is None else acc + part
            return jnp.maximum(acc, 0.0)

        zero_pad_rows()
        # Stage the input images into the interior rows of the x lane block
        # (lane-aligned: starts at lane 0).
        for b in range(bt):
            comb[b * HP + 1:b * HP + 1 + H, 0:xw] = x_ref[b]

        # conv1: reads the x block only (K = W*cin).  Shuffle of f1 is folded into w2/w3.
        y1 = conv_relu(w1_ref, xw)                           # (m_out, W*c1)
        comb[1:1 + m_out, xw:xw + aw] = y1                   # slab store (covers inner pads)
        if bt > 1:
            zero_pad_rows()                                  # restore pads before conv2

        # conv2 on cat([x, x1]) (shuffled) == one matmul over [x | x1] (K = W*(cin+c1)).
        y2 = conv_relu(w2_ref, xw + aw)                      # (m_out, W*c1)
        comb[1:1 + m_out, xw + aw:lw] = y2
        if bt > 1:
            zero_pad_rows()

        # conv3 on cat([x, x1, x2]) (shuffled) == one matmul over [x | x1 | x2] (K = lw).
        y3 = conv_relu(w3_ref, lw)                           # (m_out, W*cout), lane-dense
        for b in range(bt):
            o_ref[b] = y3[b * HP:b * HP + H, :]              # drop the 2 boundary rows

    return kernel


def _default_num_blocks(B):
    """2 'parallel' grid steps on 2-TensorCore parts (v7x, v4 megacore); 1 fat step
    on single-TC parts (v5e / v6e)."""
    if B < 2 or B % 2 != 0:
        return 1
    try:
        kind = jax.devices()[0].device_kind.lower()
    except Exception:
        kind = ""
    return 2 if any(t in kind for t in ("v7", "7x", "v4")) else 1


def efr_block_forward(x_nchw, w1, w2, w3, group=2, num_blocks=None):
    """Fused EFRBlock forward. x: NCHW, weights: HWIO dense (group-masked). Returns NCHW."""
    B, Cin, H, W = x_nchw.shape
    C1 = w1.shape[-1]
    Cout = w3.shape[-1]
    if num_blocks is None:
        num_blocks = _default_num_blocks(B)
    if B % num_blocks != 0:
        num_blocks = 1
    Bt = B // num_blocks

    x_nhwc = jnp.transpose(x_nchw, (0, 2, 3, 1))
    x_flat = x_nhwc.reshape(B, H, W * Cin)                   # (B, H, W*Cin) slab

    # Fold the two channel shuffles into conv2/conv3 input channels, split per source
    # (x / x1 / x2), and stack the banded per-dy matrices along K in the same order as
    # the combined scratch lane layout [x | x1 | x2] so concat never materializes.
    w2_eff = _fold_shuffle_into_weight(w2, group)
    w3_eff = _fold_shuffle_into_weight(w3, group)
    w2_x, w2_a = w2_eff[:, :, :Cin, :], w2_eff[:, :, Cin:, :]
    w3_x = w3_eff[:, :, :Cin, :]
    w3_a = w3_eff[:, :, Cin:Cin + C1, :]
    w3_b = w3_eff[:, :, Cin + C1:, :]

    W1s = _band_weight(w1, W)                                # (3, W*Cin,        W*C1)
    W2s = jnp.concatenate([_band_weight(w2_x, W),
                           _band_weight(w2_a, W)], axis=1)   # (3, W*(Cin+C1),   W*C1)
    W3s = jnp.concatenate([_band_weight(w3_x, W),
                           _band_weight(w3_a, W),
                           _band_weight(w3_b, W)], axis=1)   # (3, W*(Cin+2C1),  W*Cout)

    kernel = _make_efr_kernel(H, W, Cin, C1, Cout, Bt)
    const = lambda g: (0, 0, 0)                              # weights stay VMEM-resident
    # NOTE: ideally the constant-index weight specs would use pipeline_mode=pl.Buffered(1)
    # to avoid double-buffering; negligible at this size, revisit when weights grow.

    out_flat = pl.pallas_call(
        kernel,
        out_shape=jax.ShapeDtypeStruct((B, H, W * Cout), jnp.float32),
        grid=(num_blocks,),
        in_specs=[
            pl.BlockSpec((Bt, H, W * Cin), lambda g: (g, 0, 0)),
            pl.BlockSpec(W1s.shape, const),
            pl.BlockSpec(W2s.shape, const),
            pl.BlockSpec(W3s.shape, const),
        ],
        out_specs=pl.BlockSpec((Bt, H, W * Cout), lambda g: (g, 0, 0)),
        scratch_shapes=[
            # Combined padded activation scratch: rows = Bt*(H+2), lanes = [x | x1 | x2].
            pltpu.VMEM((Bt * (H + 2), W * (Cin + 2 * C1)), jnp.float32),
        ],
        compiler_params=pltpu.CompilerParams(
            dimension_semantics=("parallel",)),              # megacore batch sharding
    )(x_flat, W1s, W2s, W3s)

    out_nhwc = out_flat.reshape(B, H, W, Cout)
    return jnp.transpose(out_nhwc, (0, 3, 1, 2))


# ----------------------------------------------------------------------------
# Pure-JAX reference (lax conv + explicit concat/shuffle) for correctness check
# ----------------------------------------------------------------------------
def _conv_ref_nhwc(x, w, relu=True):
    y = jax.lax.conv_general_dilated(
        x, w, window_strides=(1, 1), padding="SAME",
        dimension_numbers=("NHWC", "HWIO", "NHWC"))
    return jnp.maximum(y, 0.0) if relu else y


def _channel_shuffle_nhwc(x, group):
    B, H, W, C = x.shape
    gc = C // group
    x = x.reshape(B, H, W, gc, group)
    x = jnp.transpose(x, (0, 1, 2, 4, 3))
    return x.reshape(B, H, W, C)


def efr_block_ref(x_nchw, w1, w2, w3, group=2):
    x = jnp.transpose(x_nchw, (0, 2, 3, 1))
    x1 = _conv_ref_nhwc(x, w1)
    f1 = _channel_shuffle_nhwc(jnp.concatenate([x, x1], axis=-1), group)
    x2 = _conv_ref_nhwc(f1, w2)
    f2 = _channel_shuffle_nhwc(jnp.concatenate([x, x1, x2], axis=-1), group)
    out = _conv_ref_nhwc(f2, w3)
    return jnp.transpose(out, (0, 3, 1, 2))


# ----------------------------------------------------------------------------
# Deterministic parameter construction (torch grouped conv == masked dense conv)
# ----------------------------------------------------------------------------
def _group_mask(cin, cout, groups):
    gi, go = cin // groups, cout // groups
    i = jnp.arange(cin)[:, None] // gi
    o = jnp.arange(cout)[None, :] // go
    return (i == o).astype(jnp.float32)


def _init_weight(key, cin, cout, groups):
    fan_in = (cin // groups) * 9
    bound = 1.0 / math.sqrt(fan_in)
    w = jax.random.uniform(key, (3, 3, cin, cout), jnp.float32, -bound, bound)
    return w * _group_mask(cin, cout, groups)[None, None, :, :]


if __name__ == "__main__":
    B, inp, H, W = 2, 4, 16, 16
    oup, ratio, groups = 8, 2, 2
    init_channels = math.ceil(inp / ratio)   # = 2

    key = jax.random.PRNGKey(0)
    k_x, k1, k2, k3 = jax.random.split(key, 4)

    x_nchw = jax.random.normal(k_x, (B, inp, H, W), jnp.float32)
    w1 = _init_weight(k1, inp, init_channels, groups)                   # first_conv
    w2 = _init_weight(k2, inp + init_channels, init_channels, groups)   # second_conv
    w3 = _init_weight(k3, inp + 2 * init_channels, oup, 1)              # final_conv

    fwd = jax.jit(efr_block_forward, static_argnames=("group", "num_blocks"))
    out = jax.block_until_ready(fwd(x_nchw, w1, w2, w3, group=groups))
    ref = efr_block_ref(x_nchw, w1, w2, w3, group=groups)

    assert out.shape == (B, oup, H, W), out.shape
    err = float(jnp.max(jnp.abs(out - ref)))
    assert jnp.allclose(out, ref, atol=1e-3, rtol=1e-3), err
    print("KERNEL_OK")
</pallas_src>

<mosaic_0001>
module attributes {stable_mosaic.version = 11 : i64} {
  func.func @kernel(%arg0: i32, %arg1: memref<2x16x64xf32, #tpu.memory_space<vmem>>, %arg2: memref<3x64x32xf32, #tpu.memory_space<vmem>>, %arg3: memref<3x96x32xf32, #tpu.memory_space<vmem>>, %arg4: memref<3x128x128xf32, #tpu.memory_space<vmem>>, %arg5: memref<2x16x128xf32, #tpu.memory_space<vmem>>, %arg6: memref<36x128xf32, #tpu.memory_space<vmem>>) attributes {dimension_semantics = [#tpu.dimension_semantics<parallel>], iteration_bounds = array<i64: 1>, scalar_prefetch = 0 : i64, scratch_operands = 1 : i64, tpu.core_type = #tpu.core_type<tc>, window_params = [{transform_indices = @transform_0, window_bounds = array<i64: 2, 16, 64>}, {pipeline_mode = #tpu.pipeline_mode<synchronous>, transform_indices = @transform_1, window_bounds = array<i64: 3, 64, 32>}, {pipeline_mode = #tpu.pipeline_mode<synchronous>, transform_indices = @transform_2, window_bounds = array<i64: 3, 96, 32>}, {pipeline_mode = #tpu.pipeline_mode<synchronous>, transform_indices = @transform_3, window_bounds = array<i64: 3, 128, 128>}, {transform_indices = @transform_4, window_bounds = array<i64: 2, 16, 128>}]} {
    %cst = arith.constant 0.000000e+00 : f32
    %0 = vector.broadcast %cst : f32 to vector<1x128xf32>
    %c0 = arith.constant 0 : index
    %c0_0 = arith.constant 0 : index
    %1 = vector.load %arg6[%c0, %c0_0] : memref<36x128xf32, #tpu.memory_space<vmem>>, vector<1x128xf32>
    tpu.vector_store %arg6[%c0, %c0_0], %0 {strides = array<i32>} : memref<36x128xf32, #tpu.memory_space<vmem>>, vector<1x128xf32>,
    %c17 = arith.constant 17 : index
    %c0_1 = arith.constant 0 : index
    %2 = vector.load %arg6[%c17, %c0_1] : memref<36x128xf32, #tpu.memory_space<vmem>>, vector<1x128xf32>
    tpu.vector_store %arg6[%c17, %c0_1], %0 {strides = array<i32>} : memref<36x128xf32, #tpu.memory_space<vmem>>, vector<1x128xf32>,
    %c18 = arith.constant 18 : index
    %c0_2 = arith.constant 0 : index
    %3 = vector.load %arg6[%c18, %c0_2] : memref<36x128xf32, #tpu.memory_space<vmem>>, vector<1x128xf32>
    tpu.vector_store %arg6[%c18, %c0_2], %0 {strides = array<i32>} : memref<36x128xf32, #tpu.memory_space<vmem>>, vector<1x128xf32>,
    %c35 = arith.constant 35 : index
    %c0_3 = arith.constant 0 : index
    %4 = vector.load %arg6[%c35, %c0_3] : memref<36x128xf32, #tpu.memory_space<vmem>>, vector<1x128xf32>
    tpu.vector_store %arg6[%c35, %c0_3], %0 {strides = array<i32>} : memref<36x128xf32, #tpu.memory_space<vmem>>, vector<1x128xf32>,
    %c0_4 = arith.constant 0 : index
    %c0_5 = arith.constant 0 : index
    %c0_6 = arith.constant 0 : index
    %5 = vector.load %arg1[%c0_4, %c0_5, %c0_6] : memref<2x16x64xf32, #tpu.memory_space<vmem>>, vector<1x16x64xf32>
    %6 = vector.shape_cast %5 : vector<1x16x64xf32> to vector<16x64xf32>
    %c1 = arith.constant 1 : index
    %c0_7 = arith.constant 0 : index
    %7 = vector.load %arg6[%c1, %c0_7] : memref<36x128xf32, #tpu.memory_space<vmem>>, vector<16x64xf32>
    tpu.vector_store %arg6[%c1, %c0_7], %6 {strides = array<i32>} : memref<36x128xf32, #tpu.memory_space<vmem>>, vector<16x64xf32>,
    %c1_8 = arith.constant 1 : index
    %c0_9 = arith.constant 0 : index
    %c0_10 = arith.constant 0 : index
    %8 = vector.load %arg1[%c1_8, %c0_9, %c0_10] : memref<2x16x64xf32, #tpu.memory_space<vmem>>, vector<1x16x64xf32>
    %9 = vector.shape_cast %8 : vector<1x16x64xf32> to vector<16x64xf32>
    %c19 = arith.constant 19 : index
    %c0_11 = arith.constant 0 : index
    %10 = vector.load %arg6[%c19, %c0_11] : memref<36x128xf32, #tpu.memory_space<vmem>>, vector<16x64xf32>
    tpu.vector_store %arg6[%c19, %c0_11], %9 {strides = array<i32>} : memref<36x128xf32, #tpu.memory_space<vmem>>, vector<16x64xf32>,
    %c0_12 = arith.constant 0 : index
    %c0_13 = arith.constant 0 : index
    %11 = vector.load %arg6[%c0_12, %c0_13] : memref<36x128xf32, #tpu.memory_space<vmem>>, vector<34x64xf32>
    %c0_14 = arith.constant 0 : index
    %c0_15 = arith.constant 0 : index
    %c0_16 = arith.constant 0 : index
    %12 = vector.load %arg2[%c0_14, %c0_15, %c0_16] : memref<3x64x32xf32, #tpu.memory_space<vmem>>, vector<1x64x32xf32>
    %13 = vector.shape_cast %12 : vector<1x64x32xf32> to vector<64x32xf32>
    %cst_17 = arith.constant dense<0.000000e+00> : vector<34x32xf32>
    %14 = tpu.matmul %11, %13, %cst_17 {dimension_numbers = #tpu.dot_dimension_numbers<[1], [0], [0], [1], [0, 0, 1, 1], [], []>} : vector<34x64xf32>, vector<64x32xf32>, vector<34x32xf32> -> vector<34x32xf32>
    %c1_18 = arith.constant 1 : index
    %c0_19 = arith.constant 0 : index
    %15 = vector.load %arg6[%c1_18, %c0_19] : memref<36x128xf32, #tpu.memory_space<vmem>>, vector<34x64xf32>
    %c1_20 = arith.constant 1 : index
    %c0_21 = arith.constant 0 : index
    %c0_22 = arith.constant 0 : index
    %16 = vector.load %arg2[%c1_20, %c0_21, %c0_22] : memref<3x64x32xf32, #tpu.memory_space<vmem>>, vector<1x64x32xf32>
    %17 = vector.shape_cast %16 : vector<1x64x32xf32> to vector<64x32xf32>
    %cst_23 = arith.constant dense<0.000000e+00> : vector<34x32xf32>
    %18 = tpu.matmul %15, %17, %cst_23 {dimension_numbers = #tpu.dot_dimension_numbers<[1], [0], [0], [1], [0, 0, 1, 1], [], []>} : vector<34x64xf32>, vector<64x32xf32>, vector<34x32xf32> -> vector<34x32xf32>
    %19 = arith.addf %14, %18 : vector<34x32xf32>
    %c2 = arith.constant 2 : index
    %c0_24 = arith.constant 0 : index
    %20 = vector.load %arg6[%c2, %c0_24] : memref<36x128xf32, #tpu.memory_space<vmem>>, vector<34x64xf32>
    %c2_25 = arith.constant 2 : index
    %c0_26 = arith.constant 0 : index
    %c0_27 = arith.constant 0 : index
    %21 = vector.load %arg2[%c2_25, %c0_26, %c0_27] : memref<3x64x32xf32, #tpu.memory_space<vmem>>, vector<1x64x32xf32>
    %22 = vector.shape_cast %21 : vector<1x64x32xf32> to vector<64x32xf32>
    %cst_28 = arith.constant dense<0.000000e+00> : vector<34x32xf32>
    %23 = tpu.matmul %20, %22, %cst_28 {dimension_numbers = #tpu.dot_dimension_numbers<[1], [0], [0], [1], [0, 0, 1, 1], [], []>} : vector<34x64xf32>, vector<64x32xf32>, vector<34x32xf32> -> vector<34x32xf32>
    %24 = arith.addf %19, %23 : vector<34x32xf32>
    %cst_29 = arith.constant 0.000000e+00 : f32
    %25 = vector.broadcast %cst_29 : f32 to vector<34x32xf32>
    %26 = arith.maximumf %24, %25 : vector<34x32xf32>
    %c1_30 = arith.constant 1 : index
    %c64 = arith.constant 64 : index
    %27 = vector.load %arg6[%c1_30, %c64] : memref<36x128xf32, #tpu.memory_space<vmem>>, vector<34x32xf32>
    tpu.vector_store %arg6[%c1_30, %c64], %26 {strides = array<i32>} : memref<36x128xf32, #tpu.memory_space<vmem>>, vector<34x32xf32>,
    %c0_31 = arith.constant 0 : index
    %c0_32 = arith.constant 0 : index
    %28 = vector.load %arg6[%c0_31, %c0_32] : memref<36x128xf32, #tpu.memory_space<vmem>>, vector<1x128xf32>
    tpu.vector_store %arg6[%c0_31, %c0_32], %0 {strides = array<i32>} : memref<36x128xf32, #tpu.memory_space<vmem>>, vector<1x128xf32>,
    %c17_33 = arith.constant 17 : index
    %c0_34 = arith.constant 0 : index
    %29 = vector.load %arg6[%c17_33, %c0_34] : memref<36x128xf32, #tpu.memory_space<vmem>>, vector<1x128xf32>
    tpu.vector_store %arg6[%c17_33, %c0_34], %0 {strides = array<i32>} : memref<36x128xf32, #tpu.memory_space<vmem>>, vector<1x128xf32>,
    %c18_35 = arith.constant 18 : index
    %c0_36 = arith.constant 0 : index
    %30 = vector.load %arg6[%c18_35, %c0_36] : memref<36x128xf32, #tpu.memory_space<vmem>>, vector<1x128xf32>
    tpu.vector_store %arg6[%c18_35, %c0_36], %0 {strides = array<i32>} : memref<36x128xf32, #tpu.memory_space<vmem>>, vector<1x128xf32>,
    %c35_37 = arith.constant 35 : index
    %c0_38 = arith.constant 0 : index
    %31 = vector.load %arg6[%c35_37, %c0_38] : memref<36x128xf32, #tpu.memory_space<vmem>>, vector<1x128xf32>
    tpu.vector_store %arg6[%c35_37, %c0_38], %0 {strides = array<i32>} : memref<36x128xf32, #tpu.memory_space<vmem>>, vector<1x128xf32>,
    %c0_39 = arith.constant 0 : index
    %c0_40 = arith.constant 0 : index
    %32 = vector.load %arg6[%c0_39, %c0_40] : memref<36x128xf32, #tpu.memory_space<vmem>>, vector<34x96xf32>
    %c0_41 = arith.constant 0 : index
    %c0_42 = arith.constant 0 : index
    %c0_43 = arith.constant 0 : index
    %33 = vector.load %arg3[%c0_41, %c0_42, %c0_43] : memref<3x96x32xf32, #tpu.memory_space<vmem>>, vector<1x96x32xf32>
    %34 = vector.shape_cast %33 : vector<1x96x32xf32> to vector<96x32xf32>
    %cst_44 = arith.constant dense<0.000000e+00> : vector<34x32xf32>
    %35 = tpu.matmul %32, %34, %cst_44 {dimension_numbers = #tpu.dot_dimension_numbers<[1], [0], [0], [1], [0, 0, 1, 1], [], []>} : vector<34x96xf32>, vector<96x32xf32>, vector<34x32xf32> -> vector<34x32xf32>
    %c1_45 = arith.constant 1 : index
    %c0_46 = arith.constant 0 : index
    %36 = vector.load %arg6[%c1_45, %c0_46] : memref<36x128xf32, #tpu.memory_space<vmem>>, vector<34x96xf32>
    %c1_47 = arith.constant 1 : index
    %c0_48 = arith.constant 0 : index
    %c0_49 = arith.constant 0 : index
    %37 = vector.load %arg3[%c1_47, %c0_48, %c0_49] : memref<3x96x32xf32, #tpu.memory_space<vmem>>, vector<1x96x32xf32>
    %38 = vector.shape_cast %37 : vector<1x96x32xf32> to vector<96x32xf32>
    %cst_50 = arith.constant dense<0.000000e+00> : vector<34x32xf32>
    %39 = tpu.matmul %36, %38, %cst_50 {dimension_numbers = #tpu.dot_dimension_numbers<[1], [0], [0], [1], [0, 0, 1, 1], [], []>} : vector<34x96xf32>, vector<96x32xf32>, vector<34x32xf32> -> vector<34x32xf32>
    %40 = arith.addf %35, %39 : vector<34x32xf32>
    %c2_51 = arith.constant 2 : index
    %c0_52 = arith.constant 0 : index
    %41 = vector.load %arg6[%c2_51, %c0_52] : memref<36x128xf32, #tpu.memory_space<vmem>>, vector<34x96xf32>
    %c2_53 = arith.constant 2 : index
    %c0_54 = arith.constant 0 : index
    %c0_55 = arith.constant 0 : index
    %42 = vector.load %arg3[%c2_53, %c0_54, %c0_55] : memref<3x96x32xf32, #tpu.memory_space<vmem>>, vector<1x96x32xf32>
    %43 = vector.shape_cast %42 : vector<1x96x32xf32> to vector<96x32xf32>
    %cst_56 = arith.constant dense<0.000000e+00> : vector<34x32xf32>
    %44 = tpu.matmul %41, %43, %cst_56 {dimension_numbers = #tpu.dot_dimension_numbers<[1], [0], [0], [1], [0, 0, 1, 1], [], []>} : vector<34x96xf32>, vector<96x32xf32>, vector<34x32xf32> -> vector<34x32xf32>
    %45 = arith.addf %40, %44 : vector<34x32xf32>
    %cst_57 = arith.constant 0.000000e+00 : f32
    %46 = vector.broadcast %cst_57 : f32 to vector<34x32xf32>
    %47 = arith.maximumf %45, %46 : vector<34x32xf32>
    %c1_58 = arith.constant 1 : index
    %c96 = arith.constant 96 : index
    %48 = vector.load %arg6[%c1_58, %c96] : memref<36x128xf32, #tpu.memory_space<vmem>>, vector<34x32xf32>
    tpu.vector_store %arg6[%c1_58, %c96], %47 {strides = array<i32>} : memref<36x128xf32, #tpu.memory_space<vmem>>, vector<34x32xf32>,
    %c0_59 = arith.constant 0 : index
    %c0_60 = arith.constant 0 : index
    %49 = vector.load %arg6[%c0_59, %c0_60] : memref<36x128xf32, #tpu.memory_space<vmem>>, vector<1x128xf32>
    tpu.vector_store %arg6[%c0_59, %c0_60], %0 {strides = array<i32>} : memref<36x128xf32, #tpu.memory_space<vmem>>, vector<1x128xf32>,
    %c17_61 = arith.constant 17 : index
    %c0_62 = arith.constant 0 : index
    %50 = vector.load %arg6[%c17_61, %c0_62] : memref<36x128xf32, #tpu.memory_space<vmem>>, vector<1x128xf32>
    tpu.vector_store %arg6[%c17_61, %c0_62], %0 {strides = array<i32>} : memref<36x128xf32, #tpu.memory_space<vmem>>, vector<1x128xf32>,
    %c18_63 = arith.constant 18 : index
    %c0_64 = arith.constant 0 : index
    %51 = vector.load %arg6[%c18_63, %c0_64] : memref<36x128xf32, #tpu.memory_space<vmem>>, vector<1x128xf32>
    tpu.vector_store %arg6[%c18_63, %c0_64], %0 {strides = array<i32>} : memref<36x128xf32, #tpu.memory_space<vmem>>, vector<1x128xf32>,
    %c35_65 = arith.constant 35 : index
    %c0_66 = arith.constant 0 : index
    %52 = vector.load %arg6[%c35_65, %c0_66] : memref<36x128xf32, #tpu.memory_space<vmem>>, vector<1x128xf32>
    tpu.vector_store %arg6[%c35_65, %c0_66], %0 {strides = array<i32>} : memref<36x128xf32, #tpu.memory_space<vmem>>, vector<1x128xf32>,
    %c0_67 = arith.constant 0 : index
    %c0_68 = arith.constant 0 : index
    %53 = vector.load %arg6[%c0_67, %c0_68] : memref<36x128xf32, #tpu.memory_space<vmem>>, vector<34x128xf32>
    %c0_69 = arith.constant 0 : index
    %c0_70 = arith.constant 0 : index
    %c0_71 = arith.constant 0 : index
    %54 = vector.load %arg4[%c0_69, %c0_70, %c0_71] : memref<3x128x128xf32, #tpu.memory_space<vmem>>, vector<1x128x128xf32>
    %55 = vector.shape_cast %54 : vector<1x128x128xf32> to vector<128x128xf32>
    %cst_72 = arith.constant dense<0.000000e+00> : vector<34x128xf32>
    %56 = tpu.matmul %53, %55, %cst_72 {dimension_numbers = #tpu.dot_dimension_numbers<[1], [0], [0], [1], [0, 0, 1, 1], [], []>} : vector<34x128xf32>, vector<128x128xf32>, vector<34x128xf32> -> vector<34x128xf32>
    %c1_73 = arith.constant 1 : index
    %c0_74 = arith.constant 0 : index
    %57 = vector.load %arg6[%c1_73, %c0_74] : memref<36x128xf32, #tpu.memory_space<vmem>>, vector<34x128xf32>
    %c1_75 = arith.constant 1 : index
    %c0_76 = arith.constant 0 : index
    %c0_77 = arith.constant 0 : index
    %58 = vector.load %arg4[%c1_75, %c0_76, %c0_77] : memref<3x128x128xf32, #tpu.memory_space<vmem>>, vector<1x128x128xf32>
    %59 = vector.shape_cast %58 : vector<1x128x128xf32> to vector<128x128xf32>
    %cst_78 = arith.constant dense<0.000000e+00> : vector<34x128xf32>
    %60 = tpu.matmul %57, %59, %cst_78 {dimension_numbers = #tpu.dot_dimension_numbers<[1], [0], [0], [1], [0, 0, 1, 1], [], []>} : vector<34x128xf32>, vector<128x128xf32>, vector<34x128xf32> -> vector<34x128xf32>
    %61 = arith.addf %56, %60 : vector<34x128xf32>
    %c2_79 = arith.constant 2 : index
    %c0_80 = arith.constant 0 : index
    %62 = vector.load %arg6[%c2_79, %c0_80] : memref<36x128xf32, #tpu.memory_space<vmem>>, vector<34x128xf32>
    %c2_81 = arith.constant 2 : index
    %c0_82 = arith.constant 0 : index
    %c0_83 = arith.constant 0 : index
    %63 = vector.load %arg4[%c2_81, %c0_82, %c0_83] : memref<3x128x128xf32, #tpu.memory_space<vmem>>, vector<1x128x128xf32>
    %64 = vector.shape_cast %63 : vector<1x128x128xf32> to vector<128x128xf32>
    %cst_84 = arith.constant dense<0.000000e+00> : vector<34x128xf32>
    %65 = tpu.matmul %62, %64, %cst_84 {dimension_numbers = #tpu.dot_dimension_numbers<[1], [0], [0], [1], [0, 0, 1, 1], [], []>} : vector<34x128xf32>, vector<128x128xf32>, vector<34x128xf32> -> vector<34x128xf32>
    %66 = arith.addf %61, %65 : vector<34x128xf32>
    %cst_85 = arith.constant 0.000000e+00 : f32
    %67 = vector.broadcast %cst_85 : f32 to vector<34x128xf32>
    %68 = arith.maximumf %66, %67 : vector<34x128xf32>
    %69 = vector.extract_strided_slice %68 {offsets = [0, 0], sizes = [16, 128], strides = [1, 1]} : vector<34x128xf32> to vector<16x128xf32>
    %c0_86 = arith.constant 0 : index
    %c0_87 = arith.constant 0 : index
    %c0_88 = arith.constant 0 : index
    %70 = vector.load %arg5[%c0_86, %c0_87, %c0_88] : memref<2x16x128xf32, #tpu.memory_space<vmem>>, vector<1x16x128xf32>
    %71 = vector.shape_cast %70 : vector<1x16x128xf32> to vector<16x128xf32>
    %72 = vector.shape_cast %69 : vector<16x128xf32> to vector<1x16x128xf32>
    tpu.vector_store %arg5[%c0_86, %c0_87, %c0_88], %72 {strides = array<i32>} : memref<2x16x128xf32, #tpu.memory_space<vmem>>, vector<1x16x128xf32>,
    %73 = vector.extract_strided_slice %68 {offsets = [18, 0], sizes = [16, 128], strides = [1, 1]} : vector<34x128xf32> to vector<16x128xf32>
    %c1_89 = arith.constant 1 : index
    %c0_90 = arith.constant 0 : index
    %c0_91 = arith.constant 0 : index
    %74 = vector.load %arg5[%c1_89, %c0_90, %c0_91] : memref<2x16x128xf32, #tpu.memory_space<vmem>>, vector<1x16x128xf32>
    %75 = vector.shape_cast %74 : vector<1x16x128xf32> to vector<16x128xf32>
    %76 = vector.shape_cast %73 : vector<16x128xf32> to vector<1x16x128xf32>
    tpu.vector_store %arg5[%c1_89, %c0_90, %c0_91], %76 {strides = array<i32>} : memref<2x16x128xf32, #tpu.memory_space<vmem>>, vector<1x16x128xf32>,
    return
  }
  func.func @transform_0(%arg0: i32) -> (i32, i32, i32) {
    %c0_i32 = arith.constant 0 : i32
    %c0_i32_0 = arith.constant 0 : i32
    %c0_i32_1 = arith.constant 0 : i32
    return %arg0, %c0_i32, %c0_i32_0 : i32, i32, i32
  }
  func.func @transform_1(%arg0: i32) -> (i32, i32, i32) {
    %c0_i32 = arith.constant 0 : i32
    %c0_i32_0 = arith.constant 0 : i32
    %c0_i32_1 = arith.constant 0 : i32
    %c0_i32_2 = arith.constant 0 : i32
    return %c0_i32, %c0_i32_0, %c0_i32_1 : i32, i32, i32
  }
  func.func @transform_2(%arg0: i32) -> (i32, i32, i32) {
    %c0_i32 = arith.constant 0 : i32
    %c0_i32_0 = arith.constant 0 : i32
    %c0_i32_1 = arith.constant 0 : i32
    %c0_i32_2 = arith.constant 0 : i32
    return %c0_i32, %c0_i32_0, %c0_i32_1 : i32, i32, i32
  }
  func.func @transform_3(%arg0: i32) -> (i32, i32, i32) {
    %c0_i32 = arith.constant 0 : i32
    %c0_i32_0 = arith.constant 0 : i32
    %c0_i32_1 = arith.constant 0 : i32
    %c0_i32_2 = arith.constant 0 : i32
    return %c0_i32, %c0_i32_0, %c0_i32_1 : i32, i32, i32
  }
  func.func @transform_4(%arg0: i32) -> (i32, i32, i32) {
    %c0_i32 = arith.constant 0 : i32
    %c0_i32_0 = arith.constant 0 : i32
    %c0_i32_1 = arith.constant 0 : i32
    return %arg0, %c0_i32, %c0_i32_0 : i32, i32, i32
  }
}

</mosaic_0001>

<bundles_post_ra>
// kernel: efr_block_forward.1
= control target key start
LH: loop header
LB: loop body
LE: loop exit
PB: predicated region body
PF: predicated region fallthrough
CT: control target
= control target key end

     0   :  { %v805_v2 = vmov 0.0   ;;  %vm23_vm0 = vcmask 523264   ;;  %vm243_vm1 = vcmask 785920   ;;  %vm248_vm2 = vcmask 779776   ;;  %s1254_s1 = inlined_call_operand.vmem [shape: f32[3,64,32], index: 1, kind: input, shape index: {}]   ;;  %s1255_s0 = inlined_call_operand.vmem [shape: f32[2,16,64], index: 0, kind: input, shape index: {}]   ;;  %s1256_s2 = inlined_call_operand.vmem [shape: f32[3,96,32], index: 2, kind: input, shape index: {}]   ;;  %s1257_s3 = inlined_call_operand.vmem [shape: f32[3,128,128], index: 3, kind: input, shape index: {}]   ;;  %s1258_s4 = inlined_call_operand.vmem [shape: f32[2,16,128], index: 4, kind: output, shape index: {}]  }
   0x1   :  { %v680_v0 = vld [vmem:[%s1254_s1 + $0x78] sm:$0xff]  ;;  %v679_v1 = vld [vmem:[%s1254_s1 + $0x70] sm:$0xff]  ;;  %17 = vst [vmem:[#allocation2] sm:$0x1] %v805_v2  ;;  %v678_v3 = vld [vmem:[%s1254_s1 + $0x68] sm:$0xff]  ;;  %vm289_vm3 = vcmask 785408  }
   0x2   :  { %778 = vmatpush.msra.mxu1 %v680_v0  ;;  %81 = vmatpush.msra.mxu0 %v680_v0  ;;  %18 = vst [vmem:[#allocation2 + $0x11] sm:$0x1] %v805_v2  ;;  %v698_v4 = vld [vmem:[%s1254_s1 + $0xb8] sm:$0xff]  ;;  %v697_v5 = vld [vmem:[%s1254_s1 + $0xb0] sm:$0xff]  ;;  %v677_v8 = vld [vmem:[%s1254_s1 + $0x60] sm:$0xff]  ;;  %vm479_vm4 = vcmask 1048320  }
   0x3   :  { %19 = vst [vmem:[#allocation2 + $0x12] sm:$0x1] %v805_v2  ;;  %189 = vmatpush.msra.mxu2 %v698_v4  ;;  %v671_v6 = vld [vmem:[%s1255_s0 + $0x10] sm:$0xff]  ;;  %v672_v7 = vld [vmem:[%s1255_s0 + $0x18] sm:$0xff]  ;;  %v696_v9 = vld [vmem:[%s1254_s1 + $0xa8] sm:$0xff]  ;;  %vm484_vm5 = vcmask 1042176  }
   0x4   :  { %779 = vmatpush.msra.mxu1 %v679_v1  ;;  %20 = vst [vmem:[#allocation2 + $0x23] sm:$0x1] %v805_v2  ;;  %82 = vmatpush.msra.mxu0 %v679_v1  ;;  %v676_v10 = vld [vmem:[%s1254_s1 + $0x58] sm:$0xff]  ;;  %v695_v11 = vld [vmem:[%s1254_s1 + $0xa0] sm:$0xff]  ;;  %v675_v12 = vld [vmem:[%s1254_s1 + $0x50] sm:$0xff] }
   0x5   :  { %29 = vst.msk [vmem:[#allocation2 + $0x13] sm:$0xff] %vm23_vm0, %v671_v6  ;;  %190 = vmatpush.msra.mxu2 %v697_v5  ;;  %v694_v13 = vld [vmem:[%s1254_s1 + $0x98] sm:$0xff]  ;;  %v21_v14 = vld [vmem:[%s1255_s0] sm:$0xff]  ;;  %v22_v15 = vld [vmem:[%s1255_s0 + $0x8] sm:$0xff] }
   0x6   :  { %780 = vmatpush.msra.mxu1 %v678_v3  ;;  %30 = vst.msk [vmem:[#allocation2 + $0x1b] sm:$0xff] %vm23_vm0, %v672_v7  ;;  %83 = vmatpush.msra.mxu0 %v678_v3  ;;  %v674_v16 = vld [vmem:[%s1254_s1 + $0x48] sm:$0xff]  ;;  %v693_v17 = vld [vmem:[%s1254_s1 + $0x90] sm:$0xff]  ;;  %v673_v18 = vld [vmem:[%s1254_s1 + $0x40] sm:$0xff] }
   0x7   :  { %191 = vmatpush.msra.mxu2 %v696_v9  ;;  %24 = vst.msk [vmem:[#allocation2 + $0x1] sm:$0xff] %vm23_vm0, %v21_v14  ;;  %v692_v19 = vld [vmem:[%s1254_s1 + $0x88] sm:$0xff]  ;;  %v43_v21 = vld [vmem:[%s1254_s1 + $0x38] sm:$0xff]  ;;  %v691_v22 = vld [vmem:[%s1254_s1 + $0x80] sm:$0xff] }
   0x8   :  { %781 = vmatpush.msra.mxu1 %v677_v8  ;;  %84 = vmatpush.msra.mxu0 %v677_v8  ;;  %25 = vst.msk [vmem:[#allocation2 + $0x9] sm:$0xff] %vm23_vm0, %v22_v15  ;;  %v42_v23 = vld [vmem:[%s1254_s1 + $0x30] sm:$0xff]  ;;  %v41_v27 = vld [vmem:[%s1254_s1 + $0x28] sm:$0xff]  ;;  %v40_v28 = vld [vmem:[%s1254_s1 + $0x20] sm:$0xff] }
   0x9   :  { %192 = vmatpush.msra.mxu2 %v695_v11  ;;  %v39_v30 = vld [vmem:[%s1254_s1 + $0x18] sm:$0xff]  ;;  %v38_v33 = vld [vmem:[%s1254_s1 + $0x10] sm:$0xff]  ;;  %v37_v35 = vld [vmem:[%s1254_s1 + $0x8] sm:$0xff] }
   0xa   :  { %782 = vmatpush.msra.mxu1 %v676_v10  ;;  %85 = vmatpush.msra.mxu0 %v676_v10  ;;  %v36_v36 = vld [vmem:[%s1254_s1] sm:$0xff]  ;;  %s806_s1 = smov 64   ;;  %v737_v54 = vld [vmem:[%s1256_s2 + $0x118] sm:$0xff]  ;;  %v736_v55 = vld [vmem:[%s1256_s2 + $0x110] sm:$0xff] }
   0xb   :  { %193 = vmatpush.msra.mxu2 %v694_v13  ;;  %v715_v57 = vld [vmem:[%s1256_s2 + $0xb8] sm:$0xff]  ;;  %v714_v59 = vld [vmem:[%s1256_s2 + $0xb0] sm:$0xff]  ;;  %v735_v61 = vld [vmem:[%s1256_s2 + $0x108] sm:$0xff] }
   0xc   :  { %783 = vmatpush.msra.mxu1 %v675_v12  ;;  %86 = vmatpush.msra.mxu0 %v675_v12  ;;  %v154_v37 = vld [vmem:[#allocation2 + $0x12] sm:$0xff]  ;;  %v713_v63 = vld [vmem:[%s1256_s2 + $0xa8] sm:$0xff]  ;;  %v734_v3 = vld [vmem:[%s1256_s2 + $0x100] sm:$0xff] }
   0xd   :  { %v47_v20 = vld [vmem:[#allocation2 + $0x19] sm:$0xff]  ;;  %194 = vmatpush.msra.mxu2 %v693_v17  ;;  %v48_v29 = vld [vmem:[#allocation2 + $0x21] sm:$0x3]  ;;  %v46_v38 = vld [vmem:[#allocation2 + $0x11] sm:$0xff]  ;;  %309 = vmatpush.msra.mxu3 %v715_v57 }
   0xe   :  { %784 = vmatpush.msra.mxu1 %v674_v16  ;;  %87 = vmatpush.msra.mxu0 %v674_v16  ;;  %v44_v24 = vld [vmem:[#allocation2 + $0x1] sm:$0xff]  ;;  %v34_v42 = vld [vmem:[#allocation2 + $0x18] sm:$0xff]  ;;  %v269_v62 = vld [vmem:[%s1256_s2 + $0x50] sm:$0xff] }
   0xf   :  { %195 = vmatpush.msra.mxu2 %v692_v19  ;;  %v31_v25 = vld [vmem:[#allocation2] sm:$0xff]  ;;  %v153_v31 = vld [vmem:[#allocation2 + $0xa] sm:$0xff]  ;;  %v270_v58 = vld [vmem:[%s1256_s2 + $0x58] sm:$0xff]  ;;  %310 = vmatpush.msra.mxu3 %v714_v59 }
  0x10   :  { %785 = vmatpush.msra.mxu1 %v673_v18  ;;  %88 = vmatpush.msra.mxu0 %v673_v18  ;;  %v152_v26 = vld [vmem:[#allocation2 + $0x2] sm:$0xff]  ;;  %250 = vst [vmem:[#allocation2] sm:$0x1] %v805_v2  ;;  %v155_v40 = vld [vmem:[#allocation2 + $0x1a] sm:$0xff]  ;;  %v33_v41 = vld [vmem:[#allocation2 + $0x10] sm:$0xff] }
  0x11   :  { %684 = vmatmul.msk.f32.vlgmr.msra.gmra.mxu1 %vm23_vm0, %v47_v20  ;;  %196 = vmatpush.msra.mxu2 %v691_v22  ;;  %v45_v32 = vld [vmem:[#allocation2 + $0x9] sm:$0xff]  ;;  %v156_v34 = vld [vmem:[#allocation2 + $0x22] sm:$0x3]  ;;  %v35_v43 = vld [vmem:[#allocation2 + $0x20] sm:$0x3] }
  0x12   :  { %128 = vmatpush.msrb.mxu1 %v43_v21  ;;  %699 = vmatmul.msk.f32.vlgmr.msra.gmra.mxu2 %vm23_vm0, %v152_v26  ;;  %253 = vst [vmem:[#allocation2 + $0x23] sm:$0x1] %v805_v2  ;;  %v32_v39 = vld [vmem:[#allocation2 + $0x8] sm:$0xff]  ;;  %v712_v5 = vld [vmem:[%s1256_s2 + $0xa0] sm:$0xff]  ;;  %v733_v8 = vld [vmem:[%s1256_s2 + $0xf8] sm:$0xff] }
  0x13   :  { %681 = vmatmul.msk.f32.vlgmr.msra.gmra.mxu0 %vm23_vm0, %v44_v24  ;;  %v268_v0 = vld [vmem:[%s1256_s2 + $0x48] sm:$0xff]  ;;  %311 = vmatpush.msra.mxu3 %v713_v63  ;;  %v267_v7 = vld [vmem:[%s1256_s2 + $0x40] sm:$0xff]  ;;  %v711_v10 = vld [vmem:[%s1256_s2 + $0x98] sm:$0xff] }
  0x14   :  { %129 = vmatpush.msrb.mxu1 %v42_v23  ;;  %356 = vmatpush.msrb.mxu0 %v270_v58  ;;  %v266_v11 = vld [vmem:[%s1256_s2 + $0x38] sm:$0xff]  ;;  %v732_v12 = vld [vmem:[%s1256_s2 + $0xf0] sm:$0xff]  ;;  %v731_v17 = vld [vmem:[%s1256_s2 + $0xe8] sm:$0xff] }
  0x15   :  { %312 = vmatpush.msra.mxu3 %v712_v5  ;;  %v710_v14 = vld [vmem:[%s1256_s2 + $0x90] sm:$0xff]  ;;  %v709_v18 = vld [vmem:[%s1256_s2 + $0x88] sm:$0xff]  ;;  %v708_v21 = vld [vmem:[%s1256_s2 + $0x80] sm:$0xff] }
  0x16   :  { %130 = vmatpush.msrb.mxu1 %v41_v27  ;;  %357 = vmatpush.msrb.mxu0 %v269_v62  ;;  %v265_v16 = vld [vmem:[%s1256_s2 + $0x30] sm:$0xff]  ;;  %v264_v20 = vld [vmem:[%s1256_s2 + $0x28] sm:$0xff]  ;;  %v263_v23 = vld [vmem:[%s1256_s2 + $0x20] sm:$0xff] }
  0x17   :  { %313 = vmatpush.msra.mxu3 %v711_v10 }
  0x18   :  { %131 = vmatpush.msrb.mxu1 %v40_v28  ;;  %358 = vmatpush.msrb.mxu0 %v268_v0 }
  0x19   :  { %685 = vmatmul.msk.f32.gmra.mxu1 %vm23_vm0, %v48_v29  ;;  %314 = vmatpush.msra.mxu3 %v710_v14  ;;  %v510_v14 = vld [vmem:[%s1257_s3 + $0x78] sm:$0xff] }
  0x1a   :  { %132 = vmatpush.msrb.mxu1 %v39_v30  ;;  %700 = vmatmul.msk.f32.gmra.mxu2 %vm23_vm0, %v153_v31 }
  0x1b   :  { %682 = vmatmul.msk.f32.gmra.mxu0 %vm23_vm0, %v45_v32  ;;  %315 = vmatpush.msra.mxu3 %v709_v18  ;;  %v508_v18 = vld [vmem:[%s1257_s3 + $0x68] sm:$0xff] }
  0x1c   :  { %133 = vmatpush.msrb.mxu1 %v38_v33  ;;  %359 = vmatpush.msrb.mxu0 %v267_v7 }
  0x1d   :  { %316 = vmatpush.msra.mxu3 %v708_v21 }
  0x1e   :  { %134 = vmatpush.msrb.mxu1 %v37_v35  ;;  %360 = vmatpush.msrb.mxu0 %v266_v11  ;;  %v262_v35 = vld [vmem:[%s1256_s2 + $0x18] sm:$0xff] }
  0x20   :  { %135 = vmatpush.msrb.mxu1 %v36_v36  ;;  %361 = vmatpush.msrb.mxu0 %v265_v16  ;;  %v730_v36 = vld [vmem:[%s1256_s2 + $0xe0] sm:$0xff]  ;;  %v509_v16 = vld [vmem:[%s1257_s3 + $0x70] sm:$0xff] }
  0x21   :  { %686 = vmatmul.msk.f32.vlgmr.msrb.gmra.mxu1 %vm23_vm0, %v31_v25 }
  0x22   :  { %701 = vmatmul.msk.f32.gmra.mxu2 %vm23_vm0, %v154_v37  ;;  %421 = vmatpush.msra.mxu1 %v737_v54  ;;  %v706_v37 = vld [vmem:[%s1256_s2 + $0x70] sm:$0xff] }
  0x23   :  { %683 = vmatmul.msk.f32.gmra.mxu0 %vm23_vm0, %v46_v38  ;;  %v261_v38 = vld [vmem:[%s1256_s2 + $0x10] sm:$0xff] }
  0x24   :  { %422 = vmatpush.msra.mxu1 %v736_v55  ;;  %362 = vmatpush.msrb.mxu0 %v264_v20 }
  0x26   :  { %423 = vmatpush.msra.mxu1 %v735_v61  ;;  %363 = vmatpush.msrb.mxu0 %v263_v23  ;;  %v507_v23 = vld [vmem:[%s1257_s3 + $0x60] sm:$0xff] }
  0x28   :  { %424 = vmatpush.msra.mxu1 %v734_v3  ;;  %364 = vmatpush.msrb.mxu0 %v262_v35  ;;  %v751_v35 = vld [vmem:[%s1257_s3 + $0xc0] sm:$0xff] }
  0x29   :  { %687 = vmatmul.msk.f32.gmra.mxu1 %vm23_vm0, %v32_v39  ;;  %v729_v39 = vld [vmem:[%s1256_s2 + $0xd8] sm:$0xff] }
  0x2a   :  { %702 = vmatmul.msk.f32.gmra.mxu2 %vm23_vm0, %v155_v40  ;;  %425 = vmatpush.msra.mxu1 %v733_v8  ;;  %v705_v40 = vld [vmem:[%s1256_s2 + $0x68] sm:$0xff] }
  0x2b   :  { %365 = vmatpush.msrb.mxu0 %v261_v38 }
  0x2c   :  { %426 = vmatpush.msra.mxu1 %v732_v12 }
  0x2e   :  { %427 = vmatpush.msra.mxu1 %v731_v17  ;;  %v756_v17 = vld [vmem:[%s1257_s3 + $0xe8] sm:$0xff] }
  0x30   :  { %428 = vmatpush.msra.mxu1 %v730_v36  ;;  %v503_v36 = vld [vmem:[%s1257_s3 + $0x40] sm:$0xff] }
  0x31   :  { %688 = vmatmul.msk.f32.gmra.mxu1 %vm23_vm0, %v33_v41  ;;  %v260_v41 = vld [vmem:[%s1256_s2 + $0x8] sm:$0xff] }
  0x32   :  { %703 = vmatmul.msk.f32.gmra.mxu2 %vm23_vm0, %v156_v34  ;;  %v707_v34 = vld [vmem:[%s1256_s2 + $0x78] sm:$0xff]  ;;  %429 = vmatpush.msra.mxu1 %v729_v39 }
  0x33   :  { %317 = vmatpush.msra.mxu3 %v707_v34  ;;  %366 = vmatpush.msrb.mxu0 %v260_v41  ;;  %v750_v39 = vld [vmem:[%s1257_s3 + $0xb8] sm:$0xff] }
  0x35   :  { %318 = vmatpush.msra.mxu3 %v706_v37 }
  0x37   :  { %319 = vmatpush.msra.mxu3 %v705_v40  ;;  %v502_v40 = vld [vmem:[%s1257_s3 + $0x38] sm:$0xff] }
  0x39   :  { %689 = vmatmul.msk.f32.gmra.mxu1 %vm23_vm0, %v34_v42  ;;  %v728_v42 = vld [vmem:[%s1256_s2 + $0xd0] sm:$0xff] }
  0x3a   :  { %430 = vmatpush.msra.mxu1 %v728_v42  ;;  %v749_v42 = vld [vmem:[%s1257_s3 + $0xb0] sm:$0xff] }
  0x41   :  { %690 = vmatmul.msk.f32.gmra.mxu1 %vm23_vm0, %v35_v43  ;;  %v704_v43 = vld [vmem:[%s1256_s2 + $0x60] sm:$0xff] }
  0x42   :  { %320 = vmatpush.msra.mxu3 %v704_v43  ;;  %v501_v43 = vld [vmem:[%s1257_s3 + $0x30] sm:$0xff] }
  0x44   :  { %565 = vmatpush.msrb.mxu3 %v510_v14  ;;  %v763_v14 = vld [vmem:[%s1257_s3 + $0x120] sm:$0xff] }
  0x46   :  { %566 = vmatpush.msrb.mxu3 %v509_v16  ;;  %v762_v16 = vld [vmem:[%s1257_s3 + $0x118] sm:$0xff] }
  0x48   :  { %567 = vmatpush.msrb.mxu3 %v508_v18  ;;  %v760_v18 = vld [vmem:[%s1257_s3 + $0x108] sm:$0xff] }
  0x4a   :  { %568 = vmatpush.msrb.mxu3 %v507_v23 }
  0x8e   :  { %v942_v44 = vpop.f32.mrf.mxu1 }
  0x90   :  { %v90_v47 = vpop.f32.mrf.mxu0 }
  0x95   :  { %v198_v46 = vpop.f32.mrf.mxu2 }
  0x96   :  { %v944_v45 = vpop.f32.mrf.mxu1 }
  0x98   :  { %v93_v52 = vpop.f32.mrf.mxu0 }
  0x9d   :  { %v201_v50 = vpop.f32.mrf.mxu2 }
  0x9e   :  { %v137_v48 = vpop.f32.mrf.mxu1 }
  0x9f   :  { %v138_v49 = vadd.f32 %v137_v48, %v90_v47 }
  0xa0   :  { %v96_v9 = vpop.f32.mrf.mxu0 }
  0xa1   :  { %v213_v51 = vadd.f32 %v198_v46, %v138_v49  ;;  %v726_v46 = vld [vmem:[%s1256_s2 + $0xc0] sm:$0xff] }
  0xa3   :  { %v218_v53 = vmax.f32 %v213_v51, 0.0 }
  0xa5   :  { %228 = vrot.lane.b32.xlu0 %v218_v53, %s806_s1  ;;  %v204_v4 = vpop.f32.mrf.mxu2 }
  0xa6   :  { %v140_v56 = vpop.f32.mrf.mxu1 }
  0xa7   :  { %v141_v60 = vadd.f32 %v140_v56, %v93_v52 }
  0xa9   :  { %v214_v1 = vadd.f32 %v201_v50, %v141_v60 }
  0xab   :  { %v219_v6 = vmax.f32 %v214_v1, 0.0 }
  0xad   :  { %230 = vrot.lane.b32.xlu0 %v219_v6, %s806_s1  ;;  %v207_v24 = vpop.f32.mrf.mxu2 }
  0xae   :  { %v143_v13 = vpop.f32.mrf.mxu1 }
  0xaf   :  { %v144_v15 = vadd.f32 %v143_v13, %v96_v9  ;;  %v758_v13 = vld [vmem:[%s1257_s3 + $0xf8] sm:$0xff] }
  0xb0   :  { %533 = vmatpush.msrb.mxu2 %v758_v13  ;;  %v764_v13 = vld [vmem:[%s1257_s3 + $0x128] sm:$0xff] }
  0xb1   :  { %v215_v19 = vadd.f32 %v204_v4, %v144_v15  ;;  %v757_v15 = vld [vmem:[%s1257_s3 + $0xf0] sm:$0xff] }
  0xb2   :  { %534 = vmatpush.msrb.mxu2 %v757_v15 }
  0xb3   :  { %v220_v22 = vmax.f32 %v215_v19, 0.0 }
  0xb4   :  { %535 = vmatpush.msrb.mxu2 %v756_v17  ;;  %v761_v17 = vld [vmem:[%s1257_s3 + $0x110] sm:$0xff] }
  0xb5   :  { %232 = vrot.lane.b32.xlu1 %v220_v22, %s806_s1  ;;  %v210_v30 = vpop.f32.mrf.mxu2  ;;  %v755_v22 = vld [vmem:[%s1257_s3 + $0xe0] sm:$0xff] }
  0xb6   :  { %v146_v25 = vpop.f32.mrf.mxu1  ;;  %536 = vmatpush.msrb.mxu2 %v755_v22 }
  0xb7   :  { %v147_v26 = vadd.f32 %v146_v25, %v942_v44  ;;  %v259_v44 = vld [vmem:[%s1256_s2] sm:$0xff]  ;;  %v754_v25 = vld [vmem:[%s1257_s3 + $0xd8] sm:$0xff] }
  0xb8   :  { %367 = vmatpush.msrb.mxu0 %v259_v44  ;;  %537 = vmatpush.msrb.mxu2 %v754_v25 }
  0xb9   :  { %v216_v27 = vadd.f32 %v207_v24, %v147_v26  ;;  %v506_v26 = vld [vmem:[%s1257_s3 + $0x58] sm:$0xff] }
  0xba   :  { %569 = vmatpush.msrb.mxu3 %v506_v26 }
  0xbb   :  { %v221_v28 = vmax.f32 %v216_v27, 0.0 }
  0xbd   :  { %234 = vrot.lane.b32.xlu1 %v221_v28, %s806_s1  ;;  %v753_v28 = vld [vmem:[%s1257_s3 + $0xd0] sm:$0xff] }
  0xbe   :  { %v149_v29 = vpop.f32.mrf.mxu1  ;;  %538 = vmatpush.msrb.mxu2 %v753_v28 }
  0xbf   :  { %v150_v31 = vadd.f32 %v149_v29, %v944_v45  ;;  %v727_v45 = vld [vmem:[%s1256_s2 + $0xc8] sm:$0xff]  ;;  %s807_s2 = smov 96   ;;  %v505_v29 = vld [vmem:[%s1257_s3 + $0x50] sm:$0xff] }
  0xc0   :  { %431 = vmatpush.msra.mxu1 %v727_v45  ;;  %570 = vmatpush.msrb.mxu3 %v505_v29  ;;  %v748_v45 = vld [vmem:[%s1257_s3 + $0xa8] sm:$0xff] }
  0xc1   :  { %v217_v32 = vadd.f32 %v210_v30, %v150_v31  ;;  %v752_v31 = vld [vmem:[%s1257_s3 + $0xc8] sm:$0xff] }
  0xc2   :  { %432 = vmatpush.msra.mxu1 %v726_v46  ;;  %539 = vmatpush.msrb.mxu2 %v752_v31  ;;  %v500_v46 = vld [vmem:[%s1257_s3 + $0x28] sm:$0xff] }
  0xc3   :  { %v222_v33 = vmax.f32 %v217_v32, 0.0  ;;  %v504_v32 = vld [vmem:[%s1257_s3 + $0x48] sm:$0xff] }
  0xc4   :  { %571 = vmatpush.msrb.mxu3 %v504_v32  ;;  %540 = vmatpush.msrb.mxu2 %v751_v35 }
  0xc5   :  { %236 = vrot.lane.b32.xlu2 %v222_v33, %s806_s1 }
  0xc6   :  { %572 = vmatpush.msrb.mxu3 %v503_v36  ;;  %541 = vmatpush.msrb.mxu2 %v750_v39 }
  0xc8   :  { %573 = vmatpush.msrb.mxu3 %v502_v40  ;;  %542 = vmatpush.msrb.mxu2 %v749_v42 }
  0xca   :  { %574 = vmatpush.msrb.mxu3 %v501_v43  ;;  %543 = vmatpush.msrb.mxu2 %v748_v45 }
  0xcc   :  { %575 = vmatpush.msrb.mxu3 %v500_v46 }
 0x117   :  { %v229_v47 = vpop.permute.xlu0 %228 }
 0x118   :  { %244 = vst.msk [vmem:[#allocation2 + $0x1] sm:$0xff] %vm243_vm1, %v229_v47 }
 0x11f   :  { %v237_v48 = vpop.permute.xlu2 %236  ;;  %v231_v49 = vpop.permute.xlu0 %230  ;;  %v271_v50 = vld [vmem:[#allocation2 + $0x1] sm:$0xff] }
 0x120   :  { %v254_v51 = vld [vmem:[#allocation2] sm:$0xff]  ;;  %249 = vst.msk [vmem:[#allocation2 + $0x21] sm:$0x3] %vm248_vm2, %v237_v48  ;;  %716 = vmatmul.msk.f32.vlgmr.msra.gmra.mxu3 %vm289_vm3, %v271_v50 }
 0x121   :  { %721 = vmatmul.msk.f32.vlgmr.msrb.gmra.mxu0 %vm289_vm3, %v254_v51  ;;  %245 = vst.msk [vmem:[#allocation2 + $0x9] sm:$0xff] %vm243_vm1, %v231_v49  ;;  %v747_v49 = vld [vmem:[%s1257_s3 + $0xa0] sm:$0xff] }
 0x122   :  { %486 = vst [vmem:[#allocation2] sm:$0x1] %v805_v2  ;;  %v499_v50 = vld [vmem:[%s1257_s3 + $0x20] sm:$0xff]  ;;  %544 = vmatpush.msrb.mxu2 %v747_v49 }
 0x123   :  { %576 = vmatpush.msrb.mxu3 %v499_v50 }
 0x127   :  { %v233_v52 = vpop.permute.xlu1 %232  ;;  %v388_v56 = vld [vmem:[#allocation2 + $0x22] sm:$0x3] }
 0x128   :  { %246 = vst.msk [vmem:[#allocation2 + $0x11] sm:$0xff] %vm243_vm1, %v233_v52  ;;  %v272_v53 = vld [vmem:[#allocation2 + $0x9] sm:$0xff]  ;;  %v275_v0 = vld [vmem:[#allocation2 + $0x21] sm:$0x3] }
 0x129   :  { %v255_v54 = vld [vmem:[#allocation2 + $0x8] sm:$0xff]  ;;  %251 = vst [vmem:[#allocation2 + $0x11] sm:$0x1] %v805_v2  ;;  %717 = vmatmul.msk.f32.gmra.mxu3 %vm289_vm3, %v272_v53 }
 0x12a   :  { %v384_v55 = vld [vmem:[#allocation2 + $0x2] sm:$0xff]  ;;  %722 = vmatmul.msk.f32.gmra.mxu0 %vm289_vm3, %v255_v54  ;;  %252 = vst [vmem:[#allocation2 + $0x12] sm:$0x1] %v805_v2 }
 0x12b   :  { %738 = vmatmul.msk.f32.vlgmr.msra.gmra.mxu1 %vm289_vm3, %v384_v55  ;;  %489 = vst [vmem:[#allocation2 + $0x23] sm:$0x1] %v805_v2 }
 0x12f   :  { %v235_v57 = vpop.permute.xlu1 %234 }
 0x130   :  { %247 = vst.msk [vmem:[#allocation2 + $0x19] sm:$0xff] %vm243_vm1, %v235_v57  ;;  %v385_v58 = vld [vmem:[#allocation2 + $0xa] sm:$0xff] }
 0x131   :  { %v273_v59 = vld [vmem:[#allocation2 + $0x11] sm:$0xff] }
 0x132   :  { %v256_v60 = vld [vmem:[#allocation2 + $0x10] sm:$0xff]  ;;  %718 = vmatmul.msk.f32.gmra.mxu3 %vm289_vm3, %v273_v59  ;;  %v498_v59 = vld [vmem:[%s1257_s3 + $0x18] sm:$0xff] }
 0x133   :  { %723 = vmatmul.msk.f32.gmra.mxu0 %vm289_vm3, %v256_v60  ;;  %739 = vmatmul.msk.f32.gmra.mxu1 %vm289_vm3, %v385_v58  ;;  %v746_v58 = vld [vmem:[%s1257_s3 + $0x98] sm:$0xff]  ;;  %v745_v60 = vld [vmem:[%s1257_s3 + $0x90] sm:$0xff] }
 0x134   :  { %545 = vmatpush.msrb.mxu2 %v746_v58  ;;  %577 = vmatpush.msrb.mxu3 %v498_v59 }
 0x136   :  { %546 = vmatpush.msrb.mxu2 %v745_v60 }
 0x137   :  { %v274_v61 = vld [vmem:[#allocation2 + $0x19] sm:$0xff] }
 0x138   :  { %v257_v62 = vld [vmem:[#allocation2 + $0x18] sm:$0xff]  ;;  %v258_v1 = vld [vmem:[#allocation2 + $0x20] sm:$0x3] }
 0x139   :  { %v386_v63 = vld [vmem:[#allocation2 + $0x12] sm:$0xff]  ;;  %v387_v3 = vld [vmem:[#allocation2 + $0x1a] sm:$0xff] }
 0x13a   :  { %719 = vmatmul.msk.f32.gmra.mxu3 %vm289_vm3, %v274_v61  ;;  %v497_v61 = vld [vmem:[%s1257_s3 + $0x10] sm:$0xff] }
 0x13b   :  { %724 = vmatmul.msk.f32.gmra.mxu0 %vm289_vm3, %v257_v62  ;;  %740 = vmatmul.msk.f32.gmra.mxu1 %vm289_vm3, %v386_v63  ;;  %v744_v62 = vld [vmem:[%s1257_s3 + $0x88] sm:$0xff] }
 0x13c   :  { %v496_v63 = vld [vmem:[%s1257_s3 + $0x8] sm:$0xff]  ;;  %578 = vmatpush.msrb.mxu3 %v497_v61  ;;  %547 = vmatpush.msrb.mxu2 %v744_v62 }
 0x13e   :  { %579 = vmatpush.msrb.mxu3 %v496_v63 }
 0x142   :  { %720 = vmatmul.msk.f32.gmra.mxu3 %vm289_vm3, %v275_v0  ;;  %v743_v0 = vld [vmem:[%s1257_s3 + $0x80] sm:$0xff] }
 0x143   :  { %725 = vmatmul.msk.f32.gmra.mxu0 %vm289_vm3, %v258_v1  ;;  %741 = vmatmul.msk.f32.gmra.mxu1 %vm289_vm3, %v387_v3  ;;  %v495_v1 = vld [vmem:[%s1257_s3] sm:$0xff]  ;;  %v774_v3 = vld [vmem:[%s1257_s3 + $0x178] sm:$0xff] }
 0x144   :  { %548 = vmatpush.msrb.mxu2 %v743_v0  ;;  %580 = vmatpush.msrb.mxu3 %v495_v1 }
 0x145   :  { %619 = vmatpush.msra.mxu0 %v774_v3 }
 0x146   :  { %786 = vmatpush.msra.mxu2 %v774_v3 }
 0x14b   :  { %742 = vmatmul.msk.f32.gmra.mxu1 %vm289_vm3, %v388_v56 }
 0x19e   :  { %v369_v4 = vpop.f32.mrf.mxu0 }
 0x1a3   :  { %v322_v5 = vpop.f32.mrf.mxu3 }
 0x1a4   :  { %v370_v6 = vadd.f32 %v369_v4, %v322_v5  ;;  %v773_v4 = vld [vmem:[%s1257_s3 + $0x170] sm:$0xff]  ;;  %v772_v5 = vld [vmem:[%s1257_s3 + $0x168] sm:$0xff] }
 0x1a5   :  { %620 = vmatpush.msra.mxu0 %v773_v4  ;;  %787 = vmatpush.msra.mxu2 %v773_v4 }
 0x1a7   :  { %v372_v7 = vpop.f32.mrf.mxu0  ;;  %621 = vmatpush.msra.mxu0 %v772_v5  ;;  %788 = vmatpush.msra.mxu2 %v772_v5 }
 0x1a8   :  { %v434_v8 = vpop.f32.mrf.mxu1 }
 0x1a9   :  { %v449_v9 = vadd.f32 %v434_v8, %v370_v6  ;;  %v771_v6 = vld [vmem:[%s1257_s3 + $0x160] sm:$0xff]  ;;  %v769_v8 = vld [vmem:[%s1257_s3 + $0x150] sm:$0xff] }
 0x1aa   :  { %622 = vmatpush.msra.mxu0 %v771_v6  ;;  %789 = vmatpush.msra.mxu2 %v771_v6 }
 0x1ab   :  { %v454_v10 = vmax.f32 %v449_v9, 0.0  ;;  %v768_v9 = vld [vmem:[%s1257_s3 + $0x148] sm:$0xff] }
 0x1ac   :  { %v325_v11 = vpop.f32.mrf.mxu3 }
 0x1ad   :  { %464 = vrot.lane.b32.xlu2 %v454_v10, %s807_s2  ;;  %v373_v12 = vadd.f32 %v372_v7, %v325_v11  ;;  %v770_v7 = vld [vmem:[%s1257_s3 + $0x158] sm:$0xff]  ;;  %v767_v10 = vld [vmem:[%s1257_s3 + $0x140] sm:$0xff] }
 0x1ae   :  { %623 = vmatpush.msra.mxu0 %v770_v7  ;;  %790 = vmatpush.msra.mxu2 %v770_v7  ;;  %v766_v11 = vld [vmem:[%s1257_s3 + $0x138] sm:$0xff] }
 0x1b0   :  { %v437_v19 = vpop.f32.mrf.mxu1  ;;  %v375_v20 = vpop.f32.mrf.mxu0  ;;  %624 = vmatpush.msra.mxu0 %v769_v8  ;;  %791 = vmatpush.msra.mxu2 %v769_v8 }
 0x1b1   :  { %v450_v21 = vadd.f32 %v437_v19, %v373_v12  ;;  %v765_v12 = vld [vmem:[%s1257_s3 + $0x130] sm:$0xff]  ;;  %v759_v19 = vld [vmem:[%s1257_s3 + $0x100] sm:$0xff] }
 0x1b2   :  { %625 = vmatpush.msra.mxu0 %v768_v9  ;;  %792 = vmatpush.msra.mxu2 %v768_v9 }
 0x1b3   :  { %v455_v24 = vmax.f32 %v450_v21, 0.0 }
 0x1b4   :  { %626 = vmatpush.msra.mxu0 %v767_v10  ;;  %793 = vmatpush.msra.mxu2 %v767_v10 }
 0x1b5   :  { %466 = vrot.lane.b32.xlu0 %v455_v24, %s807_s2  ;;  %v328_v27 = vpop.f32.mrf.mxu3 }
 0x1b6   :  { %v376_v30 = vadd.f32 %v375_v20, %v328_v27  ;;  %627 = vmatpush.msra.mxu0 %v766_v11  ;;  %794 = vmatpush.msra.mxu2 %v766_v11 }
 0x1b8   :  { %v440_v33 = vpop.f32.mrf.mxu1  ;;  %v378_v37 = vpop.f32.mrf.mxu0  ;;  %628 = vmatpush.msra.mxu0 %v765_v12  ;;  %795 = vmatpush.msra.mxu2 %v765_v12 }
 0x1b9   :  { %v451_v34 = vadd.f32 %v440_v33, %v376_v30 }
 0x1ba   :  { %629 = vmatpush.msra.mxu0 %v764_v13  ;;  %796 = vmatpush.msra.mxu2 %v764_v13 }
 0x1bb   :  { %v456_v38 = vmax.f32 %v451_v34, 0.0 }
 0x1bc   :  { %630 = vmatpush.msra.mxu0 %v763_v14  ;;  %797 = vmatpush.msra.mxu2 %v763_v14 }
 0x1bd   :  { %468 = vrot.lane.b32.xlu1 %v456_v38, %s807_s2  ;;  %v331_v41 = vpop.f32.mrf.mxu3 }
 0x1be   :  { %v379_v44 = vadd.f32 %v378_v37, %v331_v41  ;;  %631 = vmatpush.msra.mxu0 %v762_v16  ;;  %798 = vmatpush.msra.mxu2 %v762_v16 }
 0x1c0   :  { %v443_v47 = vpop.f32.mrf.mxu1  ;;  %v381_v52 = vpop.f32.mrf.mxu0  ;;  %632 = vmatpush.msra.mxu0 %v761_v17  ;;  %799 = vmatpush.msra.mxu2 %v761_v17 }
 0x1c1   :  { %v452_v48 = vadd.f32 %v443_v47, %v379_v44 }
 0x1c2   :  { %633 = vmatpush.msra.mxu0 %v760_v18  ;;  %800 = vmatpush.msra.mxu2 %v760_v18 }
 0x1c3   :  { %v457_v51 = vmax.f32 %v452_v48, 0.0 }
 0x1c4   :  { %634 = vmatpush.msra.mxu0 %v759_v19  ;;  %801 = vmatpush.msra.mxu2 %v759_v19 }
 0x1c5   :  { %470 = vrot.lane.b32.xlu2 %v457_v51, %s807_s2  ;;  %v334_v53 = vpop.f32.mrf.mxu3 }
 0x1c6   :  { %v382_v54 = vadd.f32 %v381_v52, %v334_v53 }
 0x1c8   :  { %v446_v55 = vpop.f32.mrf.mxu1 }
 0x1c9   :  { %v453_v56 = vadd.f32 %v446_v55, %v382_v54 }
 0x1cb   :  { %v458_v57 = vmax.f32 %v453_v56, 0.0 }
 0x1cd   :  { %472 = vrot.lane.b32.xlu0 %v458_v57, %s807_s2 }
 0x207   :  { %v465_v15 = vpop.permute.xlu2 %464 }
 0x208   :  { %480 = vst.msk [vmem:[#allocation2 + $0x1] sm:$0xff] %vm479_vm4, %v465_v15 }
 0x20f   :  { %v511_v20 = vld [vmem:[#allocation2 + $0x1] sm:$0xff] }
 0x210   :  { %v490_v21 = vld [vmem:[#allocation2] sm:$0xff]  ;;  %549 = vmatmul.f32.vlgmr.msrb.gmra.mxu2 %v511_v20 }
 0x211   :  { %581 = vmatmul.f32.vlgmr.msrb.gmra.mxu3 %v490_v21 }
 0x21f   :  { %v471_v22 = vpop.permute.xlu2 %470 }
 0x220   :  { %483 = vst.msk [vmem:[#allocation2 + $0x19] sm:$0xff] %vm479_vm4, %v471_v22 }
 0x227   :  { %v467_v23 = vpop.permute.xlu0 %466  ;;  %v514_v33 = vld [vmem:[#allocation2 + $0x19] sm:$0xff] }
 0x228   :  { %481 = vst.msk [vmem:[#allocation2 + $0x9] sm:$0xff] %vm479_vm4, %v467_v23 }
 0x22f   :  { %v469_v24 = vpop.permute.xlu1 %468  ;;  %v512_v25 = vld [vmem:[#allocation2 + $0x9] sm:$0xff] }
 0x230   :  { %v491_v26 = vld [vmem:[#allocation2 + $0x8] sm:$0xff]  ;;  %482 = vst.msk [vmem:[#allocation2 + $0x11] sm:$0xff] %vm479_vm4, %v469_v24  ;;  %552 = vmatmul.f32.gmra.mxu2 %v512_v25 }
 0x231   :  { %v597_v27 = vld [vmem:[#allocation2 + $0x2] sm:$0xff]  ;;  %584 = vmatmul.f32.gmra.mxu3 %v491_v26  ;;  %487 = vst [vmem:[#allocation2 + $0x11] sm:$0x1] %v805_v2 }
 0x232   :  { %635 = vmatmul.f32.vlgmr.msra.gmra.mxu0 %v597_v27  ;;  %488 = vst [vmem:[#allocation2 + $0x12] sm:$0x1] %v805_v2 }
 0x237   :  { %v493_v34 = vld [vmem:[#allocation2 + $0x18] sm:$0xff] }
 0x238   :  { %v598_v28 = vld [vmem:[#allocation2 + $0xa] sm:$0xff] }
 0x239   :  { %v513_v29 = vld [vmem:[#allocation2 + $0x11] sm:$0xff] }
 0x23a   :  { %v492_v30 = vld [vmem:[#allocation2 + $0x10] sm:$0xff]  ;;  %638 = vmatmul.f32.gmra.mxu0 %v598_v28  ;;  %555 = vmatmul.f32.gmra.mxu2 %v513_v29 }
 0x23b   :  { %587 = vmatmul.f32.gmra.mxu3 %v492_v30  ;;  %v599_v32 = vld [vmem:[#allocation2 + $0x12] sm:$0xff] }
 0x23f   :  { %v473_v31 = vpop.permute.xlu0 %472 }
 0x240   :  { %485 = vst.msk [vmem:[#allocation2 + $0x21] sm:$0x3] %vm484_vm5, %v473_v31 }
 0x242   :  { %641 = vmatmul.f32.gmra.mxu0 %v599_v32  ;;  %558 = vmatmul.f32.gmra.mxu2 %v514_v33 }
 0x243   :  { %590 = vmatmul.f32.gmra.mxu3 %v493_v34 }
 0x247   :  { %v515_v35 = vld [vmem:[#allocation2 + $0x21] sm:$0x3] }
 0x248   :  { %v494_v36 = vld [vmem:[#allocation2 + $0x20] sm:$0x3]  ;;  %v601_v2 = vld [vmem:[#allocation2 + $0x22] sm:$0x3] }
 0x249   :  { %v600_v37 = vld [vmem:[#allocation2 + $0x1a] sm:$0xff] }
 0x24a   :  { %644 = vmatmul.f32.gmra.mxu0 %v600_v37  ;;  %561 = vmatmul.f32.gmra.mxu2 %v515_v35 }
 0x24b   :  { %593 = vmatmul.f32.gmra.mxu3 %v494_v36 }
 0x252   :  { %647 = vmatmul.f32.vlgmr.msra.gmra.mxu2 %v601_v2 }
 0x293   :  { %v550_v38 = vpop.f32.mrf.mxu2 }
 0x294   :  { %v582_v39 = vpop.f32.mrf.mxu3 }
 0x295   :  { %v583_v40 = vadd.f32 %v582_v39, %v550_v38 }
 0x2af   :  { %v636_v41 = vpop.f32.mrf.mxu0 }
 0x2b0   :  { %v651_v42 = vadd.f32 %v636_v41, %v583_v40 }
 0x2b2   :  { %v656_v43 = vmax.f32 %v651_v42, 0.0 }
 0x2b3   :  { %v553_v44 = vpop.f32.mrf.mxu2 }
 0x2b4   :  { %661 = vst [vmem:[%s1258_s4] sm:$0xff] %v656_v43  ;;  %v585_v45 = vpop.f32.mrf.mxu3 }
 0x2b5   :  { %v586_v46 = vadd.f32 %v585_v45, %v553_v44 }
 0x2b7   :  { %v639_v47 = vpop.f32.mrf.mxu0 }
 0x2b8   :  { %v652_v48 = vadd.f32 %v639_v47, %v586_v46 }
 0x2ba   :  { %v657_v49 = vmax.f32 %v652_v48, 0.0 }
 0x2bc   :  { %662 = vst [vmem:[%s1258_s4 + $0x8] sm:$0xff] %v657_v49 }
 0x2bd   :  { %v556_v50 = vpop.f32.mrf.mxu2 }
 0x2be   :  { %v588_v51 = vpop.f32.mrf.mxu3 }
 0x2bf   :  { %v589_v52 = vadd.f32 %v588_v51, %v556_v50  ;;  %v642_v53 = vpop.f32.mrf.mxu0 }
 0x2c1   :  { %v653_v54 = vadd.f32 %v642_v53, %v589_v52 }
 0x2c3   :  { %v658_v55 = vmax.f32 %v653_v54, 0.0 }
 0x2c5   :  { %775 = vst [vmem:[%s1258_s4 + $0xe] sm:$0xfc] %v658_v55  ;;  %v559_v56 = vpop.f32.mrf.mxu2 }
 0x2c6   :  { %v591_v57 = vpop.f32.mrf.mxu3 }
 0x2c7   :  { %v592_v58 = vadd.f32 %v591_v57, %v559_v56  ;;  %v645_v59 = vpop.f32.mrf.mxu0 }
 0x2c9   :  { %v654_v60 = vadd.f32 %v645_v59, %v592_v58 }
 0x2cb   :  { %v659_v61 = vmax.f32 %v654_v60, 0.0 }
 0x2cd   :  { %776 = vst [vmem:[%s1258_s4 + $0x16] sm:$0xff] %v659_v61  ;;  %v562_v62 = vpop.f32.mrf.mxu2 }
 0x2ce   :  { %v594_v63 = vpop.f32.mrf.mxu3 }
 0x2cf   :  { %v595_v0 = vadd.f32 %v594_v63, %v562_v62 }
 0x2d5   :  { %v648_v1 = vpop.f32.mrf.mxu2 }
 0x2d6   :  { %v655_v3 = vadd.f32 %v648_v1, %v595_v0 }
 0x2d8   :  { %v660_v4 = vmax.f32 %v655_v3, 0.0 }
 0x2da   :  { %777 = vst [vmem:[%s1258_s4 + $0x1e] sm:$0x3] %v660_v4 }

</bundles_post_ra>
